<compile_context>
chip_gen: v6e
topology: v6e:2x2x1
jax: 0.10.0
libtpu: 0.0.40
codegen_flags: <defaults>
</compile_context>

<pallas_src>
import jax
import jax.numpy as jnp
from jax.experimental import pallas as pl
from jax.experimental.pallas import tpu as pltpu


def _round_up(n, m):
    return ((n + m - 1) // m) * m


def _vmem_capacity_bytes():
    """Best-effort physical-VMEM query; conservative 64 MiB fallback (v7x-sized)."""
    try:
        info = pltpu.get_tpu_info()
        cap = getattr(info, "vmem_capacity_bytes", None)
        if cap:
            return int(cap)
    except Exception:
        pass
    return 64 * 1024 * 1024


def _logreg_kernel(x_ref, w_ref, b_ref, o_ref):
    # x_ref: (TM, F) streamed VMEM tile; w_ref: (1, F) resident VMEM row;
    # b_ref: (1, 1) SMEM scalar; o_ref: (1, 1, TM) lane-dense output tile.
    x = x_ref[...].astype(jnp.float32)            # upcast (free-ish) if x is bf16
    w = w_ref[...].astype(jnp.float32)            # (1, F) broadcasts over rows
    z = jnp.sum(x * w, axis=-1)                   # VPU multiply + XLU lane reduce -> (TM,)
    z = z + b_ref[0, 0]                           # scalar bias from SMEM
    # Exact sigmoid. Saturation is clean: z -> -inf => exp -> inf => 0,
    # z -> +inf => exp -> 0 => 1; no NaN path.  No approx reciprocal (correctness).
    y = 1.0 / (1.0 + jnp.exp(-z))
    o_ref[...] = y.reshape(o_ref.shape)           # lane-dense (1, 1, TM) store


def logistic_regression(x, w, b, *, tm=None):
    """x: [B, F] (f32 or bf16), w: [F, 1] f32, b: [1]/[1,1] f32 -> [B, 1] f32.

    Computes sigmoid(x @ w + b), i.e. the forward pass of the PyTorch module.
    """
    B, F = x.shape
    x = jnp.asarray(x)
    if x.dtype not in (jnp.float32, jnp.bfloat16):
        x = x.astype(jnp.float32)
    w_row = jnp.asarray(w, jnp.float32).reshape(1, F)      # lane-dense weight row
    b_smem = jnp.asarray(b, jnp.float32).reshape(1, 1)

    x_itemsize = jnp.dtype(x.dtype).itemsize
    f_pad = _round_up(F, 128)                               # lane padding of a VMEM tile

    # Generation-aware budgets.
    vmem_cap = _vmem_capacity_bytes()
    if vmem_cap >= 128 * 1024 * 1024:       # v5e / v6e: 128 MiB physical VMEM
        per_buf_target = 8 * 1024 * 1024    # bytes per (double-buffered) x tile
        scoped_cap = 96 * 1024 * 1024
    else:                                   # v7x (64 MiB) or unknown: conservative
        per_buf_target = 6 * 1024 * 1024
        scoped_cap = 52 * 1024 * 1024

    # Tile selection: size by bytes, then split so the grid has >= 2 steps (v7x megacore).
    b8 = _round_up(B, 8)
    if tm is None:
        tm_bytes = max(8, (per_buf_target // (f_pad * x_itemsize)) // 8 * 8)
        n_tiles = max(1, -(-b8 // tm_bytes))                # ceil division
        if b8 >= 16:
            n_tiles = max(n_tiles, 2)                       # give both TCs work
        tm = _round_up(-(-b8 // n_tiles), 8)
    assert tm % 8 == 0, "batch tile must be a multiple of 8 (sublane constraint)"
    b_pad = _round_up(b8, tm)
    n_tiles = b_pad // tm
    if b_pad != B:
        x = jnp.pad(x, ((0, b_pad - B), (0, 0)))            # padded rows sliced off below

    # VMEM accounting with lane/sublane padding (avoid undercounting by ~4x).
    x_buf = tm * f_pad * x_itemsize                         # per x double-buffer
    w_buf = 8 * f_pad * 4                                   # weight row (sublane-padded)
    o_buf = 8 * _round_up(tm, 128) * 4                      # per output double-buffer
    vmem_need = 2 * x_buf + 2 * o_buf + w_buf
    vmem_limit = int(min(scoped_cap,
                         max(vmem_need + vmem_need // 2 + (2 << 20), 16 * 1024 * 1024)))

    out = pl.pallas_call(
        _logreg_kernel,
        out_shape=jax.ShapeDtypeStruct((n_tiles, 1, tm), jnp.float32),
        grid=(n_tiles,),
        in_specs=[
            pl.BlockSpec((tm, F), lambda i: (i, 0)),             # streamed x tiles
            pl.BlockSpec((1, F), lambda i: (0, 0)),              # resident weight row
            pl.BlockSpec(memory_space=pltpu.MemorySpace.SMEM),   # scalar bias
        ],
        out_specs=pl.BlockSpec((1, 1, tm), lambda i: (i, 0, 0)),  # lane-dense output
        compiler_params=pltpu.CompilerParams(
            dimension_semantics=("parallel",),                    # megacore on v7x
            vmem_limit_bytes=vmem_limit,
        ),
    )(x, w_row, b_smem)
    # (n_tiles, 1, tm) row-major == original row order; reshape back and drop padding.
    return out.reshape(b_pad, 1)[:B]
    # TODO(synk): for F in the tens of thousands, add a second ("arbitrary") grid axis
    # over F with a lane-dense f32 accumulator scratch.


if __name__ == "__main__":
    key = jax.random.PRNGKey(0)
    kx, kw, kb, kx2, kx3, kw3, kb3 = jax.random.split(key, 7)

    # Test 1: shapes matching the PyTorch module spec (small).
    batch, n_features = 8, 32
    x = jax.random.normal(kx, (batch, n_features), dtype=jnp.float32)
    bound = 1.0 / jnp.sqrt(jnp.float32(n_features))
    w = jax.random.uniform(kw, (n_features, 1), jnp.float32, -bound, bound)
    b = jax.random.uniform(kb, (1, 1), jnp.float32, -bound, bound)

    out = logistic_regression(x, w, b)
    jax.block_until_ready(out)
    ref = jax.nn.sigmoid(x @ w + b)
    assert out.shape == (batch, 1)
    assert jnp.allclose(out, ref, atol=1e-4, rtol=1e-4)

    # Test 2: batch not a multiple of the tile + forced multi-tile grid (13 -> pad 16, grid=(2,)).
    x2 = jax.random.normal(kx2, (13, n_features), dtype=jnp.float32)
    out2 = logistic_regression(x2, w, b, tm=8)
    jax.block_until_ready(out2)
    ref2 = jax.nn.sigmoid(x2 @ w + b)
    assert out2.shape == (13, 1)
    assert jnp.allclose(out2, ref2, atol=1e-4, rtol=1e-4)

    # Test 3: auto tile selection with >= 2 grid steps and F not a multiple of 128.
    b3, f3 = 300, 96
    x3 = jax.random.normal(kx3, (b3, f3), dtype=jnp.float32)
    bound3 = 1.0 / jnp.sqrt(jnp.float32(f3))
    w3 = jax.random.uniform(kw3, (f3, 1), jnp.float32, -bound3, bound3)
    b3b = jax.random.uniform(kb3, (1, 1), jnp.float32, -bound3, bound3)
    out3 = logistic_regression(x3, w3, b3b)
    jax.block_until_ready(out3)
    ref3 = jax.nn.sigmoid(x3 @ w3 + b3b)
    assert out3.shape == (b3, 1)
    assert jnp.allclose(out3, ref3, atol=1e-4, rtol=1e-4)

    print("KERNEL_OK")
</pallas_src>

<mosaic_0001>
module attributes {stable_mosaic.version = 11 : i64} {
  func.func @_logreg_kernel(%arg0: i32, %arg1: memref<8x32xf32, #tpu.memory_space<vmem>>, %arg2: memref<1x32xf32, #tpu.memory_space<vmem>>, %arg3: memref<1x1xf32, #tpu.memory_space<smem>>, %arg4: memref<1x1x8xf32, #tpu.memory_space<vmem>>) attributes {dimension_semantics = [#tpu.dimension_semantics<parallel>], iteration_bounds = array<i64: 1>, scalar_prefetch = 0 : i64, scratch_operands = 0 : i64, tpu.core_type = #tpu.core_type<tc>, window_params = [{transform_indices = @transform_0, window_bounds = array<i64: 8, 32>}, {pipeline_mode = #tpu.pipeline_mode<synchronous>, transform_indices = @transform_1, window_bounds = array<i64: 1, 32>}, {transform_indices = @transform_2, window_bounds = array<i64: 1, 1>}, {transform_indices = @transform_3, window_bounds = array<i64: 1, 1, 8>}]} {
    %c0 = arith.constant 0 : index
    %c0_0 = arith.constant 0 : index
    %0 = vector.load %arg1[%c0, %c0_0] : memref<8x32xf32, #tpu.memory_space<vmem>>, vector<8x32xf32>
    %c0_1 = arith.constant 0 : index
    %c0_2 = arith.constant 0 : index
    %1 = vector.load %arg2[%c0_1, %c0_2] : memref<1x32xf32, #tpu.memory_space<vmem>>, vector<1x32xf32>
    %2 = vector.broadcast %1 : vector<1x32xf32> to vector<8x32xf32>
    %3 = arith.mulf %0, %2 : vector<8x32xf32>
    %cst = arith.constant dense<0.000000e+00> : vector<8xf32>
    %4 = vector.multi_reduction <add>, %3, %cst [1] : vector<8x32xf32> to vector<8xf32>
    %c0_3 = arith.constant 0 : index
    %c0_4 = arith.constant 0 : index
    %5 = memref.load %arg3[%c0_3, %c0_4] : memref<1x1xf32, #tpu.memory_space<smem>>
    %6 = vector.broadcast %5 : f32 to vector<8xf32>
    %7 = arith.addf %4, %6 : vector<8xf32>
    %cst_5 = arith.constant 0.000000e+00 : f32
    %8 = vector.broadcast %cst_5 : f32 to vector<8xf32>
    %9 = arith.subf %8, %7 : vector<8xf32>
    %10 = math.exp %9 : vector<8xf32>
    %cst_6 = arith.constant 1.000000e+00 : f32
    %11 = vector.broadcast %cst_6 : f32 to vector<8xf32>
    %12 = arith.addf %11, %10 : vector<8xf32>
    %cst_7 = arith.constant 1.000000e+00 : f32
    %13 = vector.broadcast %cst_7 : f32 to vector<8xf32>
    %14 = arith.divf %13, %12 : vector<8xf32>
    %15 = vector.shape_cast %14 : vector<8xf32> to vector<1x1x8xf32>
    %c0_8 = arith.constant 0 : index
    %c0_9 = arith.constant 0 : index
    %c0_10 = arith.constant 0 : index
    %16 = vector.load %arg4[%c0_8, %c0_9, %c0_10] : memref<1x1x8xf32, #tpu.memory_space<vmem>>, vector<1x1x8xf32>
    tpu.vector_store %arg4[%c0_8, %c0_9, %c0_10], %15 {strides = array<i32>} : memref<1x1x8xf32, #tpu.memory_space<vmem>>, vector<1x1x8xf32>,
    return
  }
  func.func @transform_0(%arg0: i32) -> (i32, i32) {
    %c0_i32 = arith.constant 0 : i32
    %c0_i32_0 = arith.constant 0 : i32
    return %arg0, %c0_i32 : i32, i32
  }
  func.func @transform_1(%arg0: i32) -> (i32, i32) {
    %c0_i32 = arith.constant 0 : i32
    %c0_i32_0 = arith.constant 0 : i32
    %c0_i32_1 = arith.constant 0 : i32
    return %c0_i32, %c0_i32_0 : i32, i32
  }
  func.func @transform_2(%arg0: i32) -> (i32, i32) {
    %c0_i32 = arith.constant 0 : i32
    %c0_i32_0 = arith.constant 0 : i32
    %c0_i32_1 = arith.constant 0 : i32
    return %c0_i32, %c0_i32_0 : i32, i32
  }
  func.func @transform_3(%arg0: i32) -> (i32, i32, i32) {
    %c0_i32 = arith.constant 0 : i32
    %c0_i32_0 = arith.constant 0 : i32
    %c0_i32_1 = arith.constant 0 : i32
    return %arg0, %c0_i32, %c0_i32_0 : i32, i32, i32
  }
}

</mosaic_0001>

<bundles_post_ra>
// kernel: tpu_custom_call.1
= control target key start
LH: loop header
LB: loop body
LE: loop exit
PB: predicated region body
PF: predicated region fallthrough
CT: control target
= control target key end

     0   :  { %9 = vsyncpa [#allocation4], 0  ;;  %s160_s0 = inlined_call_operand.hbm [shape: f32[8,32], index: 0, kind: input, shape index: {}]   ;;  %s161_s1 = inlined_call_operand.vmem [shape: f32[1,32], index: 1, kind: input, shape index: {}]   ;;  %s162_s2 = inlined_call_operand.<no memory space> [shape: f32[1,1], index: 2, kind: input, shape index: {}]   ;;  %s163_s3 = inlined_call_operand.hbm [shape: f32[1,1,8], index: 3, kind: output, shape index: {}]  }
   0x1   :  { %10 = vsyncpa [#allocation5], 0  ;;  %s126_s12 = smov [#allocation3]  }
   0x2   :  { %s17_s13 = sshll.u32 %s126_s12, 4  ;;  %s18_s13 = int_to_ptr.vmem [resolvable:$true] %s17_s13 }
   0x3   :  { %s90_s14 = scalar_lea.vmem %s18_s13, 128  ;;  %p95_p1 = scmp.lt.s32.totalorder %s18_s13, %s18_s13 }
   0x4   :  { %p91_p0 = scmp.ne.s32.totalorder %s18_s13, %s90_s14  ;;  %p96_p2 = scmp.lt.s32.totalorder %s90_s14, %s90_s14 }
   0x6   :  { %p97_p3 = por %p96_p2, %p95_p1 }
   0x8   :  { %p98_p4 = pnand %p97_p3, %p91_p0 }
   0xa   :  { %101 = shalt.err (!%p98_p4)
}
   0xb   :  { %20 = dma.hbm_to_vmem [thread:$0]  %s160_s0, 128, %s18_s13, [#allocation4]  }
   0xc   :  { %122 = dma.done.wait [#allocation4], 128  }
   0xd   :  { %123 = vsyncadd [#allocation4], 4294967168  ;;  %v28_v0 = vld [vmem:[#allocation3] sm:$0xff]  ;;  %vm37_vm0 = vcmask 261120   ;;  %v42_v4 = vstv %s162_s2  ;;  %v51_v11 = vlaneseq  ;;  %s127_s0 = smov [#allocation6]   ;;  %vm58_vm1 = vcmask 57344  }
   0xe   :  { %v75_v1 = vld [vmem:[%s161_s1] ss:$0 sm:$0xff]  ;;  %s66_s1 = sshll.u32 %s127_s0, 4  ;;  %s67_s1 = int_to_ptr.vmem [resolvable:$true] %s66_s1 }
   0xf   :  { %v36_v2 = vmul.f32 %v75_v1, %v28_v0  ;;  %v52_v12 = vand.u32 127, %v51_v11  ;;  %v54_v13 = vshrl.u32 %v51_v11, 7  ;;  %s102_s2 = scalar_lea.vmem %s67_s1, 16  ;;  %s106_s21 = scalar_lea.vmem %s67_s1, 32 }
  0x10   :  { %p103_p5 = scmp.ne.s32.totalorder %s67_s1, %s102_s2  ;;  %p107_p6 = scmp.lt.s32.totalorder %s67_s1, %s67_s1 }
  0x11   :  { %v38_v3 = vsel %vm37_vm0, %v36_v2, 0.0  ;;  %v55_v14 = vsub.s32 %v52_v12, %v54_v13  ;;  %p108_p7 = scmp.lt.s32.totalorder %s106_s21, %s102_s2 }
  0x12   :  { %39 = vadd.xlane.f32.xlu0 %v38_v3 }
  0x13   :  { %p109_p8 = por %p108_p7, %p107_p6 }
  0x15   :  { %p110_p9 = pnand %p109_p8, %p103_p5 }
  0x9b   :  { %v40_v5 = vpop.xlane.xlu0 %39 }
  0x9c   :  { %v43_v6 = vadd.f32 %v42_v4, %v40_v5 }
  0x9e   :  { %v44_v7 = vsub.f32 0.0, %v43_v6 }
  0xa0   :  { %v45_v8 = vmul.f32 1.442695, %v44_v7 }
  0xa2   :  { %78 = vpow2.f32 %v45_v8 }
  0xaf   :  { %v79_v9 = vpop.eup %78 }
  0xb0   :  { %v47_v10 = vadd.f32 1.0, %v79_v9 }
  0xb2   :  { %80 = vrcp.f32 %v47_v10 }
  0xbf   :  { %v81_v15 = vpop.eup %80 }
  0xc0   :  { %v56_v16 = vrot.slane %v81_v15, %v55_v14 }
  0xc2   :  { %59 = vst.msk [vmem:[#allocation6] sm:$0x1] %vm58_vm1, %v56_v16 }
  0xc3   :  { %113 = shalt.err (!%p110_p9)
}
  0xc4   :  { %69 = dma.vmem_to_hbm [thread:$0]  %s67_s1, 16, %s163_s3, [#allocation5]  }
  0xc5   :  { %124 = dma.done.wait [#allocation5], 16  }
  0xc6   :  { %125 = vsyncadd [#allocation5], 4294967280 }
  0xc7   :  { %73 = vsyncpa [#allocation4], 1 }
  0xc8   :  { %74 = vsyncpa [#allocation5], 1 }

</bundles_post_ra>
